<compile_context>
chip_gen: v5e
topology: v5e:2x2
jax: 0.10.0
libtpu: 0.0.40
codegen_flags: <defaults>
</compile_context>

<pallas_src>
import jax
import jax.numpy as jnp
from jax.experimental import pallas as pl
from jax.experimental.pallas import tpu as pltpu


def _gen_latent_kernel(x_ref, w_ref, eps_ref, z_ref, mu_ref, sig_ref):
    l_pad = w_ref.shape[1] // 2
    # Single fused matmul: [mu | sigma] = x_aug @ W_combined   (f32 accumulate)
    res = jnp.dot(x_ref[...], w_ref[...], preferred_element_type=jnp.float32)
    mu = res[:, :l_pad]
    sigma = res[:, l_pad:]
    # Reparameterization in f32 (exp goes to the EUP slot).
    z = mu + jnp.exp(sigma) * eps_ref[...]
    z_ref[...] = z.astype(z_ref.dtype)
    mu_ref[...] = mu.astype(mu_ref.dtype)
    sig_ref[...] = sigma.astype(sig_ref.dtype)


def _pack_params(w_mu, b_mu, w_sigma, b_sigma, rnn_size, latent, l_pad):
    """Build the combined bf16 weight (rnn_size+1, 2*l_pad):
       columns [0, latent)             -> mu weights, bias in the last row
       columns [l_pad, l_pad+latent)   -> sigma weights, bias in the last row
       everything else zero (pad lanes)."""
    w = jnp.zeros((rnn_size + 1, 2 * l_pad), dtype=jnp.float32)
    w = w.at[:rnn_size, :latent].set(w_mu)
    w = w.at[rnn_size, :latent].set(b_mu)
    w = w.at[:rnn_size, l_pad:l_pad + latent].set(w_sigma)
    w = w.at[rnn_size, l_pad:l_pad + latent].set(b_sigma)
    return w.astype(jnp.bfloat16)


def generator_latent(x, w_mu, b_mu, w_sigma, b_sigma, eps, *, batch_tile=None):
    """x: (B, rnn_size) f32; w_mu/w_sigma pre-transposed (rnn_size, latent);
       b_mu/b_sigma: (latent,); eps: (B, latent) f32.
       Returns (z, mu, sigma), each (B, latent) f32."""
    B, rnn_size = x.shape
    latent = w_mu.shape[1]
    l_pad = ((latent + 127) // 128) * 128          # lane-dense output width
    k_aug = rnn_size + 1                           # +1 for the folded bias row

    if batch_tile is None:
        # Small B -> one grid step; large B -> 512-row tiles (multiple of 8,
        # fills MXU M and shards across v7x's two TensorCores).
        batch_tile = B if (B <= 512 or B % 512 != 0) else 512
    assert B % batch_tile == 0, "B must be divisible by batch_tile"

    w_comb = _pack_params(w_mu, b_mu, w_sigma, b_sigma, rnn_size, latent, l_pad)

    # Augment x with a ones column (bias folding) and cast to bf16 for the MXU.
    x_aug = jnp.concatenate(
        [x, jnp.ones((B, 1), dtype=x.dtype)], axis=1
    ).astype(jnp.bfloat16)

    # Zero-pad eps to the lane-dense width (pad lanes are sliced off below).
    eps_pad = jnp.zeros((B, l_pad), jnp.float32).at[:, :latent].set(
        eps.astype(jnp.float32)
    )

    grid = (B // batch_tile,)
    out_blk = pl.BlockSpec((batch_tile, l_pad), lambda i: (i, 0))
    out_sds = jax.ShapeDtypeStruct((B, l_pad), jnp.float32)

    z_p, mu_p, sig_p = pl.pallas_call(
        _gen_latent_kernel,
        out_shape=(out_sds, out_sds, out_sds),
        grid=grid,
        in_specs=[
            pl.BlockSpec((batch_tile, k_aug), lambda i: (i, 0)),
            pl.BlockSpec((k_aug, 2 * l_pad), lambda i: (0, 0)),  # resident weights
            pl.BlockSpec((batch_tile, l_pad), lambda i: (i, 0)),
        ],
        out_specs=(out_blk, out_blk, out_blk),
        compiler_params=pltpu.CompilerParams(
            dimension_semantics=("parallel",)
        ),
    )(x_aug, w_comb, eps_pad)

    return z_p[:, :latent], mu_p[:, :latent], sig_p[:, :latent]


def generator_latent_ref(x, w_mu, b_mu, w_sigma, b_sigma, eps):
    # Reference with the same bf16 parameter/activation rounding as the kernel,
    # f32 accumulation / elementwise math.
    f32 = jnp.float32
    xb = x.astype(jnp.bfloat16).astype(f32)
    wm = w_mu.astype(jnp.bfloat16).astype(f32)
    bm = b_mu.astype(jnp.bfloat16).astype(f32)
    ws = w_sigma.astype(jnp.bfloat16).astype(f32)
    bs = b_sigma.astype(jnp.bfloat16).astype(f32)
    mu = xb @ wm + bm
    sigma = xb @ ws + bs
    z = mu + jnp.exp(sigma) * eps.astype(f32)
    return z, mu, sigma


if __name__ == "__main__":
    # Module config: opt.rnn_size=32, opt.latent_vec_size=16, batch=8.
    rnn_size, latent = 32, 16
    batch = 8

    key = jax.random.PRNGKey(0)
    kx, kwm, kbm, kws, kbs, ke = jax.random.split(key, 6)

    x = jax.random.normal(kx, (batch, rnn_size), dtype=jnp.float32)

    # PyTorch nn.Linear-style uniform init; weights stored pre-transposed (in, out).
    bound = 1.0 / (rnn_size ** 0.5)
    w_mu = jax.random.uniform(kwm, (rnn_size, latent), jnp.float32, -bound, bound)
    b_mu = jax.random.uniform(kbm, (latent,), jnp.float32, -bound, bound)
    w_sigma = jax.random.uniform(kws, (rnn_size, latent), jnp.float32, -bound, bound)
    b_sigma = jax.random.uniform(kbs, (latent,), jnp.float32, -bound, bound)

    # eps ~ N(0, 1): hoisted out of forward() into an explicit input so the
    # kernel is deterministic and checkable against a pure-JAX reference.
    eps = jax.random.normal(ke, (batch, latent), dtype=jnp.float32)

    z, mu, sigma = generator_latent(x, w_mu, b_mu, w_sigma, b_sigma, eps)
    (z, mu, sigma) = jax.block_until_ready((z, mu, sigma))

    z_r, mu_r, sig_r = generator_latent_ref(x, w_mu, b_mu, w_sigma, b_sigma, eps)

    assert z.shape == (batch, latent)
    assert mu.shape == (batch, latent)
    assert sigma.shape == (batch, latent)
    assert jnp.allclose(mu, mu_r, atol=1e-4, rtol=1e-4), "mu mismatch"
    assert jnp.allclose(sigma, sig_r, atol=1e-4, rtol=1e-4), "sigma mismatch"
    assert jnp.allclose(z, z_r, atol=1e-4, rtol=1e-4), "z mismatch"

    print("KERNEL_OK")
</pallas_src>

<mosaic_0001>
module attributes {stable_mosaic.version = 11 : i64} {
  func.func @_gen_latent_kernel(%arg0: i32, %arg1: memref<8x33xbf16, #tpu.memory_space<vmem>>, %arg2: memref<33x256xbf16, #tpu.memory_space<vmem>>, %arg3: memref<8x128xf32, #tpu.memory_space<vmem>>, %arg4: memref<8x128xf32, #tpu.memory_space<vmem>>, %arg5: memref<8x128xf32, #tpu.memory_space<vmem>>, %arg6: memref<8x128xf32, #tpu.memory_space<vmem>>) attributes {dimension_semantics = [#tpu.dimension_semantics<parallel>], iteration_bounds = array<i64: 1>, scalar_prefetch = 0 : i64, scratch_operands = 0 : i64, tpu.core_type = #tpu.core_type<tc>, window_params = [{transform_indices = @transform_0, window_bounds = array<i64: 8, 33>}, {pipeline_mode = #tpu.pipeline_mode<synchronous>, transform_indices = @transform_1, window_bounds = array<i64: 33, 256>}, {transform_indices = @transform_2, window_bounds = array<i64: 8, 128>}, {transform_indices = @transform_3, window_bounds = array<i64: 8, 128>}, {transform_indices = @transform_4, window_bounds = array<i64: 8, 128>}, {transform_indices = @transform_5, window_bounds = array<i64: 8, 128>}]} {
    %c0 = arith.constant 0 : index
    %c0_0 = arith.constant 0 : index
    %0 = vector.load %arg1[%c0, %c0_0] : memref<8x33xbf16, #tpu.memory_space<vmem>>, vector<8x33xbf16>
    %c0_1 = arith.constant 0 : index
    %c0_2 = arith.constant 0 : index
    %1 = vector.load %arg2[%c0_1, %c0_2] : memref<33x256xbf16, #tpu.memory_space<vmem>>, vector<33x256xbf16>
    %cst = arith.constant dense<0.000000e+00> : vector<8x256xf32>
    %2 = tpu.matmul %0, %1, %cst {dimension_numbers = #tpu.dot_dimension_numbers<[1], [0], [0], [1], [0, 0, 1, 1], [], []>} : vector<8x33xbf16>, vector<33x256xbf16>, vector<8x256xf32> -> vector<8x256xf32>
    %3 = vector.extract_strided_slice %2 {offsets = [0, 0], sizes = [8, 128], strides = [1, 1]} : vector<8x256xf32> to vector<8x128xf32>
    %4 = vector.extract_strided_slice %2 {offsets = [0, 128], sizes = [8, 128], strides = [1, 1]} : vector<8x256xf32> to vector<8x128xf32>
    %5 = math.exp %4 : vector<8x128xf32>
    %c0_3 = arith.constant 0 : index
    %c0_4 = arith.constant 0 : index
    %6 = vector.load %arg3[%c0_3, %c0_4] : memref<8x128xf32, #tpu.memory_space<vmem>>, vector<8x128xf32>
    %7 = arith.mulf %5, %6 : vector<8x128xf32>
    %8 = arith.addf %3, %7 : vector<8x128xf32>
    %c0_5 = arith.constant 0 : index
    %c0_6 = arith.constant 0 : index
    %9 = vector.load %arg4[%c0_5, %c0_6] : memref<8x128xf32, #tpu.memory_space<vmem>>, vector<8x128xf32>
    tpu.vector_store %arg4[%c0_5, %c0_6], %8 {strides = array<i32>} : memref<8x128xf32, #tpu.memory_space<vmem>>, vector<8x128xf32>,
    %c0_7 = arith.constant 0 : index
    %c0_8 = arith.constant 0 : index
    %10 = vector.load %arg5[%c0_7, %c0_8] : memref<8x128xf32, #tpu.memory_space<vmem>>, vector<8x128xf32>
    tpu.vector_store %arg5[%c0_7, %c0_8], %3 {strides = array<i32>} : memref<8x128xf32, #tpu.memory_space<vmem>>, vector<8x128xf32>,
    %c0_9 = arith.constant 0 : index
    %c0_10 = arith.constant 0 : index
    %11 = vector.load %arg6[%c0_9, %c0_10] : memref<8x128xf32, #tpu.memory_space<vmem>>, vector<8x128xf32>
    tpu.vector_store %arg6[%c0_9, %c0_10], %4 {strides = array<i32>} : memref<8x128xf32, #tpu.memory_space<vmem>>, vector<8x128xf32>,
    return
  }
  func.func @transform_0(%arg0: i32) -> (i32, i32) {
    %c0_i32 = arith.constant 0 : i32
    %c0_i32_0 = arith.constant 0 : i32
    return %arg0, %c0_i32 : i32, i32
  }
  func.func @transform_1(%arg0: i32) -> (i32, i32) {
    %c0_i32 = arith.constant 0 : i32
    %c0_i32_0 = arith.constant 0 : i32
    %c0_i32_1 = arith.constant 0 : i32
    return %c0_i32, %c0_i32_0 : i32, i32
  }
  func.func @transform_2(%arg0: i32) -> (i32, i32) {
    %c0_i32 = arith.constant 0 : i32
    %c0_i32_0 = arith.constant 0 : i32
    return %arg0, %c0_i32 : i32, i32
  }
  func.func @transform_3(%arg0: i32) -> (i32, i32) {
    %c0_i32 = arith.constant 0 : i32
    %c0_i32_0 = arith.constant 0 : i32
    return %arg0, %c0_i32 : i32, i32
  }
  func.func @transform_4(%arg0: i32) -> (i32, i32) {
    %c0_i32 = arith.constant 0 : i32
    %c0_i32_0 = arith.constant 0 : i32
    return %arg0, %c0_i32 : i32, i32
  }
  func.func @transform_5(%arg0: i32) -> (i32, i32) {
    %c0_i32 = arith.constant 0 : i32
    %c0_i32_0 = arith.constant 0 : i32
    return %arg0, %c0_i32 : i32, i32
  }
}

</mosaic_0001>

<bundles_post_ra>
// kernel: tpu_custom_call.1
= control target key start
LH: loop header
LB: loop body
LE: loop exit
PB: predicated region body
PF: predicated region fallthrough
CT: control target
= control target key end

     0   :  { %11 = vsyncpa [#allocation3], 0  ;;  %s432_s0 = inlined_call_operand.hbm [shape: bf16[8,33], index: 0, kind: input, shape index: {}]   ;;  %s433_s1 = inlined_call_operand.hbm [shape: bf16[33,256], index: 1, kind: input, shape index: {}]   ;;  %s434_s2 = inlined_call_operand.hbm [shape: f32[8,128], index: 2, kind: input, shape index: {}]   ;;  %s435_s3 = inlined_call_operand.hbm [shape: f32[8,128], index: 3, kind: output, shape index: {0}]   ;;  %s436_s4 = inlined_call_operand.hbm [shape: f32[8,128], index: 4, kind: output, shape index: {1}]   ;;  %s437_s5 = inlined_call_operand.hbm [shape: f32[8,128], index: 5, kind: output, shape index: {2}]  }
   0x1   :  { %12 = vsyncpa [#allocation6], 0 }
   0x2   :  { %13 = vsyncpa [#allocation4], 0  ;;  %s30_s20 = sshll.u32 %s433_s1, 4  ;;  %s31_s20 = int_to_ptr.hbm [resolvable:$true] %s30_s20 }
   0x3   :  { %14 = vsyncpa [#allocation10], 0  ;;  %s375_s21 = smov [#allocation5]   ;;  %s20_s25 = sshll.u32 %s432_s0, 4  ;;  %s21_s25 = int_to_ptr.hbm [resolvable:$true] %s20_s25 }
   0x4   :  { %s32_s22 = sshll.u32 %s375_s21, 4  ;;  %s376_s26 = smov 128   ;;  %s33_s22 = int_to_ptr.vmem [resolvable:$true] %s32_s22 }
   0x5   :  { %s377_s27 = smov 8   ;;  %s378_s28 = smov [#allocation2]  }
   0x6   :  { %38 = dma.hbm_to_vmem [thread:$0]  %s31_s20, 640, %s33_s22, [#allocation6], %s376_s26, %s376_s26, %s377_s27  }
   0x7   :  { %s22_s29 = sshll.u32 %s378_s28, 4  ;;  %s44_s7 = sshll.u32 %s434_s2, 4  ;;  %s23_s29 = int_to_ptr.vmem [resolvable:$true] %s22_s29  ;;  %s45_s7 = int_to_ptr.hbm [resolvable:$true] %s44_s7 }
   0x8   :  { %25 = dma.hbm_to_vmem [thread:$0]  %s21_s25, 64, %s23_s29, [#allocation3]  }
   0x9   :  { %s379_s1 = smov [#allocation7]  }
   0xa   :  { %s46_s8 = sshll.u32 %s379_s1, 4  ;;  %s47_s8 = int_to_ptr.vmem [resolvable:$true] %s46_s8 }
   0xb   :  { %49 = dma.hbm_to_vmem [thread:$0]  %s45_s7, 128, %s47_s8, [#allocation6]  }
   0xc   :  { %367 = dma.done.wait [#allocation3], 64  }
   0xd   :  { %368 = vsyncadd [#allocation3], 4294967232 }
   0xe   :  { %369 = dma.done.wait [#allocation6], 768  }
   0xf   :  { %370 = vsyncadd [#allocation6], 4294966528  ;;  %vm98_vm0 = vcmask 1040384   ;;  %v68_v0 = vld [vmem:[#allocation5 + $0x20] sm:$0x11]  ;;  %v380_v3 = vmov 0  }
  0x10   :  { %v82_v1 = vunpack.c.l.b16 %v68_v0  ;;  %v83_v2 = vunpack.c.h.b16 %v68_v0  ;;  %v100_v4 = vsel %vm98_vm0, 65535, %v380_v3  ;;  %v200_v7 = vld [vmem:[#allocation5 + $0x10] sm:$0xf]  ;;  %v211_v8 = vld [vmem:[#allocation5 + $0x14] sm:$0xf0]  ;;  %vm94_vm1 = vcmask 269312  }
  0x11   :  { %v210_v9 = vld [vmem:[#allocation5 + $0x14] sm:$0xf]  ;;  %v202_v10 = vld [vmem:[#allocation5 + $0x18] sm:$0xf0]  ;;  %v201_v13 = vor.u32 %v211_v8, %v200_v7  ;;  %v192_v15 = vld [vmem:[#allocation5] sm:$0xf] }
  0x12   :  { %v88_v5 = vpack.c.b16 %v82_v1, %v82_v1  ;;  %v89_v6 = vpack.c.b16 %v83_v2, %v83_v2  ;;  %v205_v14 = vor.u32 %v210_v9, %v202_v10  ;;  %v209_v16 = vld [vmem:[#allocation5 + $0x4] sm:$0xf0]  ;;  %v208_v17 = vld [vmem:[#allocation5 + $0x4] sm:$0xf]  ;;  %v194_v18 = vld [vmem:[#allocation5 + $0x8] sm:$0xf0] }
  0x13   :  { %v193_v19 = vor.u32 %v209_v16, %v192_v15  ;;  %v197_v20 = vor.u32 %v208_v17, %v194_v18  ;;  %v63_v21 = vld [vmem:[#allocation2] sm:$0xf]  ;;  %s381_s0 = smov [#allocation9]   ;;  %s159_s11 = sshll.u32 %s436_s4, 4  ;;  %v135_v25 = vld [vmem:[#allocation7] sm:$0xff]  ;;  %s160_s11 = int_to_ptr.hbm [resolvable:$true] %s159_s11 }
  0x14   :  { %v102_v11 = vand.u32 %v100_v4, %v88_v5  ;;  %v105_v12 = vand.u32 %v100_v4, %v89_v6  ;;  %s157_s2 = sshll.u32 %s381_s0, 4  ;;  %s382_s12 = smov [#allocation11]   ;;  %s158_s2 = int_to_ptr.vmem [resolvable:$true] %s157_s2 }
  0x15   :  { %s168_s13 = sshll.u32 %s382_s12, 4  ;;  %s170_s16 = sshll.u32 %s437_s5, 4  ;;  %s169_s13 = int_to_ptr.vmem [resolvable:$true] %s168_s13  ;;  %s171_s16 = int_to_ptr.hbm [resolvable:$true] %s170_s16 }
  0x16   :  { %112 = vmatpush.bf16.msra.mxu0 %v102_v11  ;;  %125 = vmatpush.bf16.msra.mxu1 %v105_v12  ;;  %s383_s4 = smov [#allocation8]   ;;  %s148_s19 = sshll.u32 %s435_s3, 4  ;;  %s149_s19 = int_to_ptr.hbm [resolvable:$true] %s148_s19 }
  0x17   :  { %s146_s17 = sshll.u32 %s383_s4, 4  ;;  %s147_s17 = int_to_ptr.vmem [resolvable:$true] %s146_s17 }
  0x1a   :  { %113 = vmatpush.bf16.msra.mxu0 %v201_v13  ;;  %126 = vmatpush.bf16.msra.mxu1 %v205_v14 }
  0x1e   :  { %114 = vmatpush.bf16.msra.mxu0 %v193_v19  ;;  %127 = vmatpush.bf16.msra.mxu1 %v197_v20 }
  0x21   :  { %206 = vmatmul.msk.bf16.vlgmr.msra.gmra.mxu0 %vm94_vm1, %v63_v21  ;;  %207 = vmatmul.msk.bf16.vlgmr.msra.gmra.mxu1 %vm94_vm1, %v63_v21 }
  0x9e   :  { %v116_v22 = vpop.f32.mrf.mxu0  ;;  %v129_v23 = vpop.f32.mrf.mxu1 }
  0x9f   :  { %139 = vst [vmem:[#allocation9] sm:$0xff] %v116_v22  ;;  %v133_v24 = vmul.f32 1.442695, %v129_v23 }
  0xa0   :  { %140 = vst [vmem:[#allocation11] sm:$0xff] %v129_v23  ;;  %162 = dma.vmem_to_hbm [thread:$0]  %s158_s2, 128, %s160_s11, [#allocation10]  }
  0xa1   :  { %221 = vpow2.f32 %v133_v24  ;;  %173 = dma.vmem_to_hbm [thread:$0]  %s169_s13, 128, %s171_s16, [#allocation10]  }
  0xa6   :  { %v118_v26 = vpop.f32.mrf.mxu0  ;;  %v131_v27 = vpop.f32.mrf.mxu1 }
  0xa7   :  { %v222_v28 = vpop.eup %221 }
  0xa8   :  { %v136_v29 = vmul.f32 %v222_v28, %v135_v25 }
  0xaa   :  { %v137_v30 = vadd.f32 %v136_v29, %v116_v22 }
  0xac   :  { %138 = vst [vmem:[#allocation8] sm:$0xff] %v137_v30 }
  0xad   :  { %151 = dma.vmem_to_hbm [thread:$0]  %s147_s17, 128, %s149_s19, [#allocation4]  }
  0xae   :  { %371 = dma.done.wait [#allocation4], 128  }
  0xaf   :  { %372 = vsyncadd [#allocation4], 4294967168 }
  0xb0   :  { %373 = dma.done.wait [#allocation10], 256  }
  0xb1   :  { %374 = vsyncadd [#allocation10], 4294967040 }
  0xb2   :  { %186 = vsyncpa [#allocation3], 1 }
  0xb3   :  { %187 = vsyncpa [#allocation6], 1 }
  0xb4   :  { %188 = vsyncpa [#allocation4], 1 }
  0xb5   :  { %189 = vsyncpa [#allocation10], 1 }

</bundles_post_ra>
